<compile_context>
chip_gen: v6e
topology: v6e:2x2x1
jax: 0.10.0
libtpu: 0.0.40
codegen_flags: <defaults>
</compile_context>

<pallas_src>
import functools
import math

import jax
import jax.numpy as jnp
from jax.experimental import pallas as pl
from jax.experimental.pallas import tpu as pltpu


_VMEM_LIMIT_BYTES = 32 * 1024 * 1024          # safe on v5e/v6e (128 MiB) and v7x (64 MiB)
_TARGET_BLOCK_BYTES = 2 * 1024 * 1024         # mem-bound sweet spot for tile size


def _sphere_rowwise_kernel(x_ref, o_ref, *, radius):
    """Block (TB, N): each row is one vector, normalized along the lane axis."""
    x = x_ref[...].astype(jnp.float32)
    sq = jnp.sum(x * x, axis=-1, keepdims=True)           # (TB, 1)
    scale = radius * jax.lax.rsqrt(sq)                     # radius folded into scale
    o_ref[...] = (x * scale).astype(o_ref.dtype)


def _sphere_folded_kernel(x_ref, o_ref, *, seg, radius):
    """Block (TB, 128): k = 128 // seg independent length-`seg` vectors packed
    along the lane axis of every row (lane-dense layout for small N)."""
    x = x_ref[...].astype(jnp.float32)                     # (TB, W), W = k * seg
    tb, width = x.shape
    k = width // seg
    x2 = x * x
    # Per-segment sums of squares, gathered into one (TB, k) tensor so the
    # EUP rsqrt runs once instead of k times.
    sums = [jnp.sum(x2[:, j * seg:(j + 1) * seg], axis=-1, keepdims=True)
            for j in range(k)]                             # k x (TB, 1)
    inv = radius * jax.lax.rsqrt(jnp.concatenate(sums, axis=-1))   # (TB, k)
    # Expand each per-segment scale across its `seg` lanes -> dense (TB, W)
    # scale, then ONE dense multiply and ONE unmasked full-width store.
    scale = jnp.concatenate(
        [jnp.broadcast_to(inv[:, j:j + 1], (tb, seg)) for j in range(k)],
        axis=-1)                                           # (TB, W)
    o_ref[...] = (x * scale).astype(o_ref.dtype)


def _pick_tile_rows(rows, width, itemsize, target_block_bytes):
    """Largest sublane-aligned row tile ~target_block_bytes, with >=2 grid
    blocks whenever the problem is big enough (dual-TensorCore chips)."""
    if itemsize >= 4:
        align = 8
    elif itemsize == 2:
        align = 16
    else:
        align = 32
    if rows <= align:
        return rows                                        # full-dim block is always legal
    tb = (target_block_bytes // max(1, width * itemsize)) // align * align
    tb = max(align, tb)
    half = -(-rows // 2)                                    # ceil(rows / 2)
    half = -(-half // align) * align                        # round up to alignment
    tb = min(tb, half)
    rows_al = -(-rows // align) * align
    return min(tb, rows_al)


def sphere_embedded_forward(x, radius=1.0):
    """radius * x / ||x||_{-1}, matching SphereEmbedded.forward semantics."""
    if radius <= 0.0:
        raise ValueError(
            "The radius has to be a positive real number. Got {}".format(radius)
        )
    orig_shape = x.shape
    n = orig_shape[-1]
    batch = math.prod(orig_shape[:-1]) if len(orig_shape) > 1 else 1
    x2 = x.reshape(batch, n)
    itemsize = x2.dtype.itemsize

    # Lane-dense fold for small sphere dims: pack k vectors per 128-lane row.
    use_fold = (n < 128) and (128 % n == 0) and (n >= 8) and (batch % (128 // n) == 0)
    if use_fold:
        k = 128 // n
        rows, width = batch // k, 128
        x2 = x2.reshape(rows, width)                        # free, contiguous reshape
        kernel = functools.partial(_sphere_folded_kernel, seg=n, radius=float(radius))
    else:
        rows, width = batch, n
        kernel = functools.partial(_sphere_rowwise_kernel, radius=float(radius))

    # TODO(synk): very large n (where even an 8-row block exceeds VMEM) would
    # need a K-split reduction grid axis; not handled here.
    tb = _pick_tile_rows(rows, width, itemsize, _TARGET_BLOCK_BYTES)
    grid = pl.cdiv(rows, tb)                                # ragged last block: OOB rows never written

    out = pl.pallas_call(
        kernel,
        out_shape=jax.ShapeDtypeStruct((rows, width), x2.dtype),
        grid=(grid,),
        in_specs=[pl.BlockSpec((tb, width), lambda i: (i, 0))],
        out_specs=pl.BlockSpec((tb, width), lambda i: (i, 0)),
        compiler_params=pltpu.CompilerParams(
            dimension_semantics=("parallel",),
            vmem_limit_bytes=_VMEM_LIMIT_BYTES,
        ),
    )(x2)

    return out.reshape(orig_shape)


if __name__ == "__main__":
    key = jax.random.PRNGKey(0)

    # Main case: SphereEmbedded(size=(2, 4, 32)) -> two tensorial dims, n = 32.
    radius = 2.5
    size = (2, 4, 32)
    x = jax.random.normal(key, size, dtype=jnp.float32)
    y = jax.block_until_ready(sphere_embedded_forward(x, radius=radius))
    ref = radius * x / jnp.linalg.norm(x, axis=-1, keepdims=True)
    err = float(jnp.max(jnp.abs(y - ref)))
    assert err < 1e-5, f"max abs error {err}"
    norms = jnp.linalg.norm(y, axis=-1)
    assert float(jnp.max(jnp.abs(norms - radius))) < 1e-4

    # Row-wise path (n >= 128) with a ragged (cdiv) grid.
    x2 = jax.random.normal(jax.random.PRNGKey(1), (3, 7, 128), dtype=jnp.float32)
    y2 = jax.block_until_ready(sphere_embedded_forward(x2, radius=1.0))
    ref2 = x2 / jnp.linalg.norm(x2, axis=-1, keepdims=True)
    err2 = float(jnp.max(jnp.abs(y2 - ref2)))
    assert err2 < 1e-5, f"max abs error (rowwise path) {err2}"

    # bf16 inputs: folded path, f32 reduction, bf16 output.
    x3 = jax.random.normal(jax.random.PRNGKey(2), (4, 5, 64), dtype=jnp.bfloat16)
    y3 = jax.block_until_ready(sphere_embedded_forward(x3, radius=radius))
    x3f = x3.astype(jnp.float32)
    ref3 = radius * x3f / jnp.linalg.norm(x3f, axis=-1, keepdims=True)
    err3 = float(jnp.max(jnp.abs(y3.astype(jnp.float32) - ref3)))
    assert err3 < 5e-2, f"max abs error (bf16 path) {err3}"

    # Multi-block folded path (grid > 1, "parallel" row tiles).
    x4 = jax.random.normal(jax.random.PRNGKey(3), (64, 16, 32), dtype=jnp.float32)
    y4 = jax.block_until_ready(sphere_embedded_forward(x4, radius=1.0))
    ref4 = x4 / jnp.linalg.norm(x4, axis=-1, keepdims=True)
    err4 = float(jnp.max(jnp.abs(y4 - ref4)))
    assert err4 < 1e-5, f"max abs error (multi-block folded path) {err4}"

    print("KERNEL_OK")
</pallas_src>

<mosaic_0001>
module attributes {stable_mosaic.version = 11 : i64} {
  func.func @_sphere_folded_kernel(%arg0: i32, %arg1: memref<2x128xf32, #tpu.memory_space<vmem>>, %arg2: memref<2x128xf32, #tpu.memory_space<vmem>>) attributes {dimension_semantics = [#tpu.dimension_semantics<parallel>], iteration_bounds = array<i64: 1>, scalar_prefetch = 0 : i64, scratch_operands = 0 : i64, tpu.core_type = #tpu.core_type<tc>, window_params = [{transform_indices = @transform_0, window_bounds = array<i64: 2, 128>}, {transform_indices = @transform_1, window_bounds = array<i64: 2, 128>}]} {
    %c0 = arith.constant 0 : index
    %c0_0 = arith.constant 0 : index
    %0 = vector.load %arg1[%c0, %c0_0] : memref<2x128xf32, #tpu.memory_space<vmem>>, vector<2x128xf32>
    %1 = arith.mulf %0, %0 : vector<2x128xf32>
    %2 = vector.extract_strided_slice %1 {offsets = [0, 0], sizes = [2, 32], strides = [1, 1]} : vector<2x128xf32> to vector<2x32xf32>
    %cst = arith.constant dense<0.000000e+00> : vector<2xf32>
    %3 = vector.multi_reduction <add>, %2, %cst [1] : vector<2x32xf32> to vector<2xf32>
    %4 = vector.shape_cast %3 : vector<2xf32> to vector<2x1xf32>
    %5 = vector.extract_strided_slice %1 {offsets = [0, 32], sizes = [2, 32], strides = [1, 1]} : vector<2x128xf32> to vector<2x32xf32>
    %cst_1 = arith.constant dense<0.000000e+00> : vector<2xf32>
    %6 = vector.multi_reduction <add>, %5, %cst_1 [1] : vector<2x32xf32> to vector<2xf32>
    %7 = vector.shape_cast %6 : vector<2xf32> to vector<2x1xf32>
    %8 = vector.extract_strided_slice %1 {offsets = [0, 64], sizes = [2, 32], strides = [1, 1]} : vector<2x128xf32> to vector<2x32xf32>
    %cst_2 = arith.constant dense<0.000000e+00> : vector<2xf32>
    %9 = vector.multi_reduction <add>, %8, %cst_2 [1] : vector<2x32xf32> to vector<2xf32>
    %10 = vector.shape_cast %9 : vector<2xf32> to vector<2x1xf32>
    %11 = vector.extract_strided_slice %1 {offsets = [0, 96], sizes = [2, 32], strides = [1, 1]} : vector<2x128xf32> to vector<2x32xf32>
    %cst_3 = arith.constant dense<0.000000e+00> : vector<2xf32>
    %12 = vector.multi_reduction <add>, %11, %cst_3 [1] : vector<2x32xf32> to vector<2xf32>
    %13 = vector.shape_cast %12 : vector<2xf32> to vector<2x1xf32>
    %14 = tpu.concatenate %4, %7, %10, %13 in 1 : vector<2x1xf32>, vector<2x1xf32>, vector<2x1xf32>, vector<2x1xf32> -> vector<2x4xf32>
    %15 = math.rsqrt %14 : vector<2x4xf32>
    %cst_4 = arith.constant 2.500000e+00 : f32
    %16 = vector.broadcast %cst_4 : f32 to vector<2x4xf32>
    %17 = arith.mulf %16, %15 : vector<2x4xf32>
    %18 = vector.extract_strided_slice %17 {offsets = [0, 0], sizes = [2, 1], strides = [1, 1]} : vector<2x4xf32> to vector<2x1xf32>
    %19 = vector.shape_cast %18 : vector<2x1xf32> to vector<2x1xf32>
    %20 = vector.broadcast %19 : vector<2x1xf32> to vector<2x32xf32>
    %21 = vector.extract_strided_slice %17 {offsets = [0, 1], sizes = [2, 1], strides = [1, 1]} : vector<2x4xf32> to vector<2x1xf32>
    %22 = vector.shape_cast %21 : vector<2x1xf32> to vector<2x1xf32>
    %23 = vector.broadcast %22 : vector<2x1xf32> to vector<2x32xf32>
    %24 = vector.extract_strided_slice %17 {offsets = [0, 2], sizes = [2, 1], strides = [1, 1]} : vector<2x4xf32> to vector<2x1xf32>
    %25 = vector.shape_cast %24 : vector<2x1xf32> to vector<2x1xf32>
    %26 = vector.broadcast %25 : vector<2x1xf32> to vector<2x32xf32>
    %27 = vector.extract_strided_slice %17 {offsets = [0, 3], sizes = [2, 1], strides = [1, 1]} : vector<2x4xf32> to vector<2x1xf32>
    %28 = vector.shape_cast %27 : vector<2x1xf32> to vector<2x1xf32>
    %29 = vector.broadcast %28 : vector<2x1xf32> to vector<2x32xf32>
    %30 = tpu.concatenate %20, %23, %26, %29 in 1 : vector<2x32xf32>, vector<2x32xf32>, vector<2x32xf32>, vector<2x32xf32> -> vector<2x128xf32>
    %31 = arith.mulf %0, %30 : vector<2x128xf32>
    %c0_5 = arith.constant 0 : index
    %c0_6 = arith.constant 0 : index
    %32 = vector.load %arg2[%c0_5, %c0_6] : memref<2x128xf32, #tpu.memory_space<vmem>>, vector<2x128xf32>
    tpu.vector_store %arg2[%c0_5, %c0_6], %31 {strides = array<i32>} : memref<2x128xf32, #tpu.memory_space<vmem>>, vector<2x128xf32>,
    return
  }
  func.func @transform_0(%arg0: i32) -> (i32, i32) {
    %c0_i32 = arith.constant 0 : i32
    %c0_i32_0 = arith.constant 0 : i32
    return %arg0, %c0_i32 : i32, i32
  }
  func.func @transform_1(%arg0: i32) -> (i32, i32) {
    %c0_i32 = arith.constant 0 : i32
    %c0_i32_0 = arith.constant 0 : i32
    return %arg0, %c0_i32 : i32, i32
  }
}

</mosaic_0001>

<bundles_post_ra>
// kernel: tpu_custom_call.1
= control target key start
LH: loop header
LB: loop body
LE: loop exit
PB: predicated region body
PF: predicated region fallthrough
CT: control target
= control target key end

     0   :  { %6 = vsyncpa [#allocation3], 0  ;;  %s179_s0 = inlined_call_operand.hbm [shape: f32[2,128], index: 0, kind: input, shape index: {}]   ;;  %s180_s1 = inlined_call_operand.hbm [shape: f32[2,128], index: 1, kind: output, shape index: {}]  }
   0x1   :  { %7 = vsyncpa [#allocation4], 0  ;;  %s154_s6 = smov [#allocation2]  }
   0x2   :  { %s14_s7 = sshll.u32 %s154_s6, 4  ;;  %s15_s7 = int_to_ptr.vmem [resolvable:$true] %s14_s7 }
   0x3   :  { %s118_s8 = scalar_lea.vmem %s15_s7, 32  ;;  %p123_p1 = scmp.lt.s32.totalorder %s15_s7, %s15_s7 }
   0x4   :  { %p119_p0 = scmp.ne.s32.totalorder %s15_s7, %s118_s8  ;;  %p124_p2 = scmp.lt.s32.totalorder %s118_s8, %s118_s8 }
   0x6   :  { %p125_p3 = por %p124_p2, %p123_p1 }
   0x8   :  { %p126_p4 = pnand %p125_p3, %p119_p0 }
   0xa   :  { %129 = shalt.err (!%p126_p4)
}
   0xb   :  { %17 = dma.hbm_to_vmem [thread:$0]  %s179_s0, 32, %s15_s7, [#allocation3]  }
   0xc   :  { %150 = dma.done.wait [#allocation3], 32  }
   0xd   :  { %151 = vsyncadd [#allocation3], 4294967264  ;;  %v21_v0 = vld [vmem:[#allocation2] sm:$0x3]  ;;  %s155_s11 = smov 96   ;;  %s156_s12 = smov 32  }
   0xe   :  { %v22_v1 = vmul.f32 %v21_v0, %v21_v0  ;;  %s157_s13 = smov 64   ;;  %vm23_vm0 = vcmask 254976   ;;  %v158_v9 = vmov 1   ;;  %v159_v10 = vmov 0   ;;  %s162_s0 = smov [#allocation5]  }
   0xf   :  { %104 = vset.pattern.permute.xlu1 %v158_v9  ;;  %103 = vset.pattern.permute.xlu0 %v159_v10  ;;  %vm46_vm1 = vcmask 7168   ;;  %vm48_vm2 = vcmask 15360   ;;  %vm50_vm3 = vcmask 23552   ;;  %v160_v20 = vmov 2   ;;  %s85_s14 = sshll.u32 %s162_s0, 4  ;;  %s86_s14 = int_to_ptr.vmem [resolvable:$true] %s85_s14 }
  0x10   :  { %28 = vrot.lane.b32.xlu0 %v22_v1, %s155_s11  ;;  %40 = vrot.lane.b32.xlu1 %v22_v1, %s156_s12  ;;  %v24_v2 = vsel %vm23_vm0, %v22_v1, 0.0  ;;  %v161_v21 = vmov 3   ;;  %vm71_vm4 = vcmask 261120   ;;  %vm73_vm5 = vcmask 523264   ;;  %s130_s15 = scalar_lea.vmem %s86_s14, 32  ;;  %p135_p6 = scmp.lt.s32.totalorder %s86_s14, %s86_s14 }
  0x11   :  { %vm75_vm6 = vcmask 785408   ;;  %p131_p5 = scmp.ne.s32.totalorder %s86_s14, %s130_s15  ;;  %p136_p7 = scmp.lt.s32.totalorder %s130_s15, %s130_s15 }
  0x13   :  { %p137_p8 = por %p136_p7, %p135_p6 }
  0x14   :  { %34 = vrot.lane.b32.xlu0 %v22_v1, %s157_s13 }
  0x15   :  { %p138_p9 = pnand %p137_p8, %p131_p5 }
  0x34   :  { %25 = vadd.xlane.f32.xlu1 %v24_v2 }
  0x82   :  { %v29_v3 = vpop.permute.xlu0 %28  ;;  %v41_v4 = vpop.permute.xlu1 %40 }
  0x83   :  { %v31_v5 = vsel %vm23_vm0, %v29_v3, 0.0  ;;  %v43_v6 = vsel %vm23_vm0, %v41_v4, 0.0 }
  0x84   :  { %32 = vadd.xlane.f32.xlu0 %v31_v5  ;;  %44 = vadd.xlane.f32.xlu1 %v43_v6 }
  0x86   :  { %v35_v7 = vpop.permute.xlu0 %34 }
  0x87   :  { %v37_v8 = vsel %vm23_vm0, %v35_v7, 0.0 }
  0x88   :  { %38 = vadd.xlane.f32.xlu0 %v37_v8 }
  0xbd   :  { %v26_v11 = vpop.xlane.xlu1 %25 }
 0x10d   :  { %v33_v12 = vpop.xlane.xlu0 %32  ;;  %v45_v13 = vpop.xlane.xlu1 %44 }
 0x10e   :  { %v47_v14 = vsel %vm46_vm1, %v26_v11, %v33_v12 }
 0x111   :  { %v39_v15 = vpop.xlane.xlu0 %38 }
 0x112   :  { %v49_v16 = vsel %vm48_vm2, %v47_v14, %v39_v15 }
 0x113   :  { %v51_v17 = vsel %vm50_vm3, %v49_v16, %v45_v13 }
 0x114   :  { %108 = vrsqrt.f32 %v51_v17 }
 0x121   :  { %v109_v18 = vpop.eup %108 }
 0x122   :  { %v53_v19 = vmul.f32 2.5, %v109_v18 }
 0x124   :  { %60 = vperm.xlu1 %104, %v53_v19   ;;  %56 = vperm.xlu0 %103, %v53_v19  }
 0x128   :  { %105 = vset.pattern.permute.xlu1 %v160_v20  ;;  %107 = vset.pattern.permute.xlu0 %v161_v21 }
 0x129   :  { %64 = vperm.xlu1 %105, %v53_v19  }
 0x12d   :  { %106 = vset.pattern.permute.xlu1 %v161_v21 }
 0x12e   :  { %68 = vperm.xlu1 %106, %v53_v19  }
 0x19f   :  { %v61_v22 = vpop.permute.xlu1 %60  ;;  %v57_v24 = vpop.permute.xlu0 %56 }
 0x1a0   :  { %v72_v25 = vsel %vm71_vm4, %v57_v24, %v61_v22 }
 0x1a4   :  { %v65_v23 = vpop.permute.xlu1 %64 }
 0x1a5   :  { %v74_v26 = vsel %vm73_vm5, %v72_v25, %v65_v23 }
 0x1a9   :  { %v69_v27 = vpop.permute.xlu1 %68 }
 0x1aa   :  { %v76_v28 = vsel %vm75_vm6, %v74_v26, %v69_v27 }
 0x1ab   :  { %v77_v29 = vmul.f32 %v76_v28, %v21_v0 }
 0x1ad   :  { %78 = vst [vmem:[#allocation5] sm:$0x3] %v77_v29 }
 0x1ae   :  { %141 = shalt.err (!%p138_p9)
}
 0x1af   :  { %88 = dma.vmem_to_hbm [thread:$0]  %s86_s14, 32, %s180_s1, [#allocation4]  }
 0x1b0   :  { %152 = dma.done.wait [#allocation4], 32  }
 0x1b1   :  { %153 = vsyncadd [#allocation4], 4294967264 }
 0x1b2   :  { %92 = vsyncpa [#allocation3], 1 }
 0x1b3   :  { %93 = vsyncpa [#allocation4], 1 }

</bundles_post_ra>
